<compile_context>
chip_gen: v6e
topology: v6e:2x2x1
jax: 0.10.0
libtpu: 0.0.40
codegen_flags: <defaults>
</compile_context>

<pallas_src>
import numpy as np

import jax
import jax.numpy as jnp
from jax.experimental import pallas as pl
from jax.experimental.pallas import tpu as pltpu


def _drop_path_kernel(scale_ref, x_ref, o_ref):
    """o = x * per-sample keep scale (scale already in x.dtype)."""
    o_ref[...] = x_ref[...] * scale_ref[...]


def _tpu_budgets():
    """Return (max_block_bytes, vmem_limit_bytes) tuned per TPU generation."""
    kind = ""
    try:
        kind = jax.devices()[0].device_kind.lower()
    except Exception:  # defensive: never fail tile selection on a query
        pass
    if "v7" in kind:
        # 64 MiB VMEM per TensorCore: keep the whole double-buffered pipeline
        # footprint (2 in-bufs + 2 out-bufs ~= 32 MiB) well under 48 MiB.
        return 8 * 1024 * 1024, 48 * 1024 * 1024
    if "v6" in kind:
        # 128 MiB physical VMEM, 32 MiB default scoped limit -> raise it and
        # use large blocks for the last few % of the 1.3-1.4 TB/s roofline.
        return 8 * 1024 * 1024, 64 * 1024 * 1024
    if "v5" in kind:
        # 128 MiB physical, but only a 16 MiB default scoped limit -> an
        # explicit larger limit keeps 8 MiB blocks fully double-buffered.
        return 8 * 1024 * 1024, 48 * 1024 * 1024
    # Unknown / older generation: conservative but still double-bufferable.
    return 4 * 1024 * 1024, 48 * 1024 * 1024


def _round_up(v: int, m: int) -> int:
    return (v + m - 1) // m * m


def _pick_tiles(n: int, d: int, itemsize: int, max_block_bytes: int):
    """Choose (TN, TD): sublane tile over batch, lane-dense tile over features."""
    # Batch tile: full batch when small (exempt from the 8-multiple rule),
    # otherwise a multiple of 8.
    tn = n if n <= 256 else 256

    # Lane tile: as large as the per-block byte budget allows, kept a multiple
    # of 128.  No arbitrary cap -- this kernel is pure HBM streaming, so bigger
    # lane-dense blocks amortize the ~0.35 us/step pipeline overhead.
    td_cap = max(128, (max_block_bytes // max(1, tn * itemsize)) // 128 * 128)
    if d <= td_cap:
        td = d  # spans the full feature dim -> exempt from the 128-multiple rule
    else:
        td = td_cap

    # v7x has two TensorCores: guarantee >= 2 grid steps along a "parallel"
    # axis for non-trivially-sized tensors so both cores drive HBM streams.
    if (pl.cdiv(n, tn) == 1 and pl.cdiv(d, td) == 1
            and n * d * itemsize > 4 * 1024 * 1024 and d >= 256):
        td_half = _round_up(pl.cdiv(d, 2), 128)
        if td_half < d:
            td = td_half
    return tn, td


def drop_path_pallas(x: jax.Array, key: jax.Array, drop_prob: float = 0.0,
                     training: bool = False, scale_by_keep: bool = True,
                     donate_x: bool = False) -> jax.Array:
    """Pallas implementation of drop_path (stochastic depth) forward."""
    if drop_prob == 0.0 or not training:
        return x

    orig_shape = x.shape
    n = x.shape[0]
    d = int(np.prod(x.shape[1:])) if x.ndim > 1 else 1
    x2 = x.reshape(n, d)
    keep_prob = 1.0 - drop_prob

    # Per-sample keep scale, computed once in the wrapper (hoisted out of the
    # tiled loop) and precast to x.dtype -> kernel is a pure broadcast mul.
    keep = jax.random.bernoulli(key, p=keep_prob, shape=(n, 1))
    scale = keep.astype(x.dtype)
    if scale_by_keep and keep_prob > 0.0:
        scale = scale / jnp.asarray(keep_prob, dtype=x.dtype)

    itemsize = jnp.dtype(x2.dtype).itemsize
    max_block_bytes, vmem_limit = _tpu_budgets()
    tn, td = _pick_tiles(n, d, itemsize, max_block_bytes)
    grid = (pl.cdiv(n, tn), pl.cdiv(d, td))

    out = pl.pallas_call(
        _drop_path_kernel,
        out_shape=jax.ShapeDtypeStruct((n, d), x.dtype),
        grid=grid,
        in_specs=[
            pl.BlockSpec((tn, 1), lambda i, j: (i, 0)),     # per-sample scale
            pl.BlockSpec((tn, td), lambda i, j: (i, j)),    # x tile
        ],
        out_specs=pl.BlockSpec((tn, td), lambda i, j: (i, j)),
        compiler_params=pltpu.CompilerParams(
            dimension_semantics=("parallel", "parallel"),
            vmem_limit_bytes=vmem_limit),
        cost_estimate=pl.CostEstimate(
            flops=n * d,
            transcendentals=0,
            bytes_accessed=2 * n * d * itemsize + n * itemsize),
        input_output_aliases=({1: 0} if donate_x else {}),
    )(scale, x2)

    return out.reshape(orig_shape)


class DropPath:
    """DropPath regularizer (Stochastic Depth) per sample (Pallas/TPU)."""

    def __init__(self, drop_prob: float = 0.0, scale_by_keep: bool = True):
        self.drop_prob = drop_prob
        self.scale_by_keep = scale_by_keep
        self.training = True

    def __call__(self, x: jax.Array, seed: int = 0) -> jax.Array:
        # Callers should vary `seed` (or pass their own key to
        # drop_path_pallas) per layer/step to avoid reusing the same mask.
        key = jax.random.PRNGKey(seed)
        return drop_path_pallas(x, key, self.drop_prob, self.training,
                                self.scale_by_keep)


if __name__ == "__main__":
    key = jax.random.PRNGKey(0)
    # Small NCHW input consistent with the module's generic (N, ...) contract.
    x = jax.random.normal(key, (2, 4, 16, 16), dtype=jnp.float32)

    drop_prob = 0.3
    layer = DropPath(drop_prob=drop_prob, scale_by_keep=True)
    layer.training = True

    out = layer(x, seed=1234)
    out = jax.block_until_ready(out)

    assert out.shape == x.shape and out.dtype == x.dtype
    keep_prob = 1.0 - drop_prob
    # Each sample must be either fully zeroed or scaled by 1/keep_prob.
    for i in range(x.shape[0]):
        oi = np.asarray(out[i])
        xi = np.asarray(x[i])
        kept = np.allclose(oi, xi / keep_prob, rtol=1e-5, atol=1e-5)
        dropped = np.allclose(oi, 0.0)
        assert kept or dropped, f"sample {i}: not a valid drop-path output"

    # scale_by_keep=False path: kept samples must equal the input exactly.
    layer2 = DropPath(drop_prob=drop_prob, scale_by_keep=False)
    layer2.training = True
    out2 = jax.block_until_ready(layer2(x, seed=7))
    for i in range(x.shape[0]):
        oi = np.asarray(out2[i])
        xi = np.asarray(x[i])
        assert np.allclose(oi, xi) or np.allclose(oi, 0.0)

    # Eval / drop_prob=0 path returns input unchanged.
    layer.training = False
    out_eval = jax.block_until_ready(layer(x, seed=1234))
    assert np.allclose(np.asarray(out_eval), np.asarray(x))

    print("KERNEL_OK")
</pallas_src>

<mosaic_0001>
module attributes {stable_mosaic.version = 11 : i64} {
  func.func @_drop_path_kernel(%arg0: i32, %arg1: i32, %arg2: memref<2x1xf32, #tpu.memory_space<vmem>>, %arg3: memref<2x1024xf32, #tpu.memory_space<vmem>>, %arg4: memref<2x1024xf32, #tpu.memory_space<vmem>>) attributes {dimension_semantics = [#tpu.dimension_semantics<parallel>, #tpu.dimension_semantics<parallel>], iteration_bounds = array<i64: 1, 1>, scalar_prefetch = 0 : i64, scratch_operands = 0 : i64, tpu.core_type = #tpu.core_type<tc>, window_params = [{transform_indices = @transform_0, window_bounds = array<i64: 2, 1>}, {transform_indices = @transform_1, window_bounds = array<i64: 2, 1024>}, {transform_indices = @transform_2, window_bounds = array<i64: 2, 1024>}]} {
    %c0 = arith.constant 0 : index
    %c0_0 = arith.constant 0 : index
    %0 = vector.load %arg3[%c0, %c0_0] : memref<2x1024xf32, #tpu.memory_space<vmem>>, vector<2x1024xf32>
    %c0_1 = arith.constant 0 : index
    %c0_2 = arith.constant 0 : index
    %1 = vector.load %arg2[%c0_1, %c0_2] : memref<2x1xf32, #tpu.memory_space<vmem>>, vector<2x1xf32>
    %2 = vector.broadcast %1 : vector<2x1xf32> to vector<2x1024xf32>
    %3 = arith.mulf %0, %2 : vector<2x1024xf32>
    %c0_3 = arith.constant 0 : index
    %c0_4 = arith.constant 0 : index
    %4 = vector.load %arg4[%c0_3, %c0_4] : memref<2x1024xf32, #tpu.memory_space<vmem>>, vector<2x1024xf32>
    tpu.vector_store %arg4[%c0_3, %c0_4], %3 {strides = array<i32>} : memref<2x1024xf32, #tpu.memory_space<vmem>>, vector<2x1024xf32>,
    return
  }
  func.func @transform_0(%arg0: i32, %arg1: i32) -> (i32, i32) {
    %c0_i32 = arith.constant 0 : i32
    %c0_i32_0 = arith.constant 0 : i32
    return %arg0, %c0_i32 : i32, i32
  }
  func.func @transform_1(%arg0: i32, %arg1: i32) -> (i32, i32) {
    %c0_i32 = arith.constant 0 : i32
    return %arg0, %arg1 : i32, i32
  }
  func.func @transform_2(%arg0: i32, %arg1: i32) -> (i32, i32) {
    %c0_i32 = arith.constant 0 : i32
    return %arg0, %arg1 : i32, i32
  }
}

</mosaic_0001>

<bundles_post_ra>
// kernel: tpu_custom_call.1
= control target key start
LH: loop header
LB: loop body
LE: loop exit
PB: predicated region body
PF: predicated region fallthrough
CT: control target
= control target key end

     0   :  { %7 = vsyncpa [#allocation3], 0  ;;  %s135_s0 = inlined_call_operand.vmem [shape: f32[2,1], index: 0, kind: input, shape index: {}]   ;;  %s136_s1 = inlined_call_operand.hbm [shape: f32[2,1024], index: 1, kind: input, shape index: {}]   ;;  %s137_s2 = inlined_call_operand.hbm [shape: f32[2,1024], index: 2, kind: output, shape index: {}]  }
   0x1   :  { %8 = vsyncpa [#allocation4], 0  ;;  %s107_s9 = smov [#allocation2]  }
   0x2   :  { %s17_s10 = sshll.u32 %s107_s9, 4  ;;  %s18_s10 = int_to_ptr.vmem [resolvable:$true] %s17_s10 }
   0x3   :  { %s71_s11 = scalar_lea.vmem %s18_s10, 256  ;;  %p76_p1 = scmp.lt.s32.totalorder %s18_s10, %s18_s10 }
   0x4   :  { %p72_p0 = scmp.ne.s32.totalorder %s18_s10, %s71_s11  ;;  %p77_p2 = scmp.lt.s32.totalorder %s71_s11, %s71_s11 }
   0x6   :  { %p78_p3 = por %p77_p2, %p76_p1 }
   0x8   :  { %p79_p4 = pnand %p78_p3, %p72_p0 }
   0xa   :  { %82 = shalt.err (!%p79_p4)
}
   0xb   :  { %20 = dma.hbm_to_vmem [thread:$0]  %s136_s1, 256, %s18_s10, [#allocation3]  }
   0xc   :  { %103 = dma.done.wait [#allocation3], 256  }
   0xd   :  { %104 = vsyncadd [#allocation3], 4294967040  ;;  %v108_v0 = vmov 0   ;;  %v26_v1 = vld [vmem:[%s135_s0] sm:$0x3]  ;;  %v34_v4 = vlaneseq  ;;  %v25_v10 = vld [vmem:[#allocation2 + $0x8] sm:$0xff] }
   0xe   :  { %62 = vset.pattern.permute.xlu0 %v108_v0  ;;  %v109_v2 = vmov 269488144   ;;  %v24_v9 = vld [vmem:[#allocation2] sm:$0xff]  ;;  %s110_s16 = smov [#allocation5]  }
   0xf   :  { %29 = vperm.xlu0 %62, %v26_v1   ;;  %v32_v3 = vunpack.c.l.s4 %v109_v2  ;;  %v35_v6 = vshrl.u32 %v34_v4, 7  ;;  %s49_s1 = sshll.u32 %s110_s16, 4  ;;  %s50_s1 = int_to_ptr.vmem [resolvable:$true] %s49_s1 }
  0x10   :  { %s83_s17 = scalar_lea.vmem %s50_s1, 256  ;;  %p88_p6 = scmp.lt.s32.totalorder %s50_s1, %s50_s1 }
  0x11   :  { %v33_v5 = vunpack.c.0.s8 %v32_v3  ;;  %p84_p5 = scmp.ne.s32.totalorder %s50_s1, %s83_s17  ;;  %p89_p7 = scmp.lt.s32.totalorder %s83_s17, %s83_s17 }
  0x13   :  { %v36_v7 = vsub.s32 %v33_v5, %v35_v6  ;;  %p90_p8 = por %p89_p7, %p88_p6 }
  0x15   :  { %p91_p9 = pnand %p90_p8, %p84_p5 }
  0x8a   :  { %v30_v8 = vpop.permute.xlu0 %29 }
  0x8b   :  { %v37_v11 = vrot.slane %v30_v8, %v36_v7 }
  0x8d   :  { %v39_v12 = vmul.f32 %v37_v11, %v24_v9  ;;  %v40_v13 = vmul.f32 %v37_v11, %v25_v10 }
  0x8f   :  { %41 = vst [vmem:[#allocation5] sm:$0xff] %v39_v12  ;;  %42 = vst [vmem:[#allocation5 + $0x8] sm:$0xff] %v40_v13 }
  0x90   :  { %94 = shalt.err (!%p91_p9)
}
  0x91   :  { %52 = dma.vmem_to_hbm [thread:$0]  %s50_s1, 256, %s137_s2, [#allocation4]  }
  0x92   :  { %105 = dma.done.wait [#allocation4], 256  }
  0x93   :  { %106 = vsyncadd [#allocation4], 4294967040 }
  0x94   :  { %56 = vsyncpa [#allocation3], 1 }
  0x95   :  { %57 = vsyncpa [#allocation4], 1 }

</bundles_post_ra>
